<compile_context>
chip_gen: v5e
topology: v5e:2x2
jax: 0.10.0
libtpu: 0.0.40
codegen_flags: <defaults>
</compile_context>

<pallas_src>
import numpy as np
import jax
import jax.numpy as jnp
from jax.experimental import pallas as pl
from jax.experimental.pallas import tpu as pltpu


def _round_up(n, m):
    return ((n + m - 1) // m) * m


def _gfp_kernel(x_ref, w_ref, b_ref, o_ref):
    # x_ref: (TB, 1)  w_ref: (1, Hp)  b_ref: (1, Hp)  o_ref: (TB, Hp)
    # VPU broadcast multiply-add (kept off the MXU on purpose), f32 math,
    # one unmasked lane-dense store, cast-at-store for bf16 outputs.
    theta = x_ref[...] * w_ref[...] + b_ref[...]        # (TB, Hp) f32
    o_ref[...] = jnp.sin(theta).astype(o_ref.dtype)


def make_gfp_tables(W):
    """One-time constant fold (W is a frozen, non-trainable buffer).

    Returns lane-padded w_full = [W, W] * 2*pi and bias = [0..0, pi/2..pi/2],
    each of length round_up(2*H, 128).  Padded tail is zeros -> sin(0)=0,
    discarded (or ignored) by the wrapper.
    """
    H = W.shape[0]
    two_h = 2 * H
    hp = _round_up(two_h, 128)
    w_full = jnp.concatenate([W, W]).astype(jnp.float32) * (2.0 * np.pi)
    bias = jnp.concatenate([
        jnp.zeros((H,), jnp.float32),
        jnp.full((H,), np.pi / 2.0, jnp.float32),
    ])
    if hp != two_h:
        w_full = jnp.pad(w_full, (0, hp - two_h))
        bias = jnp.pad(bias, (0, hp - two_h))
    return w_full, bias


def gaussian_fourier_projection(x, w_full, bias, embed_dim, *,
                                out_dtype=jnp.float32, trim=True):
    """x: (B,) f32; w_full/bias: (Hp,) from make_gfp_tables.

    Returns (B, embed_dim) when trim=True, otherwise the padded (Bp, Hp)
    kernel output (pad columns hold sin(0)=0; pad rows are junk-free zeros).
    Skipping the trim avoids an extra HBM read+write of the output when the
    consumer can handle the padded layout.
    """
    B = x.shape[0]
    Hp = w_full.shape[0]                       # padded 2*H, multiple of 128
    out_dtype = jnp.dtype(out_dtype)

    # Batch tile: native sublane multiple (8 rows f32, 16 rows bf16).
    sublane = 16 if out_dtype == jnp.dtype(jnp.bfloat16) else 8
    bytes_per_row = Hp * out_dtype.itemsize
    # 4 MiB output tile cap (~8 MiB double-buffered) -> safe inside v7x's
    # 32 MiB scoped-VMEM default; already past the roofline knee on v5e/v6e.
    tb_cap = (4 * 1024 * 1024) // max(bytes_per_row, 1)
    tb_cap = max(sublane, min(1024, (tb_cap // sublane) * sublane))
    # Target >= 4 grid steps when B allows so v7x's two TensorCores both get
    # work on the single "parallel" axis (harmless on v5e/v6e).
    tb_target = _round_up(max(-(-B // 4), sublane), sublane)
    tb = max(sublane, min(tb_cap, tb_target))
    Bp = _round_up(B, tb)

    x2d = x.reshape(B, 1).astype(jnp.float32)
    if Bp != B:
        x2d = jnp.pad(x2d, ((0, Bp - B), (0, 0)))
    w2d = w_full.reshape(1, Hp).astype(jnp.float32)
    b2d = bias.reshape(1, Hp).astype(jnp.float32)

    cost = pl.CostEstimate(
        flops=2 * Bp * Hp,
        transcendentals=Bp * Hp,
        bytes_accessed=Bp * Hp * out_dtype.itemsize + Bp * 4 + 2 * Hp * 4,
    )

    out = pl.pallas_call(
        _gfp_kernel,
        out_shape=jax.ShapeDtypeStruct((Bp, Hp), out_dtype),
        grid_spec=pl.GridSpec(
            grid=(Bp // tb,),
            in_specs=[
                pl.BlockSpec((tb, 1), lambda i: (i, 0)),
                pl.BlockSpec((1, Hp), lambda i: (0, 0)),
                pl.BlockSpec((1, Hp), lambda i: (0, 0)),
            ],
            out_specs=pl.BlockSpec((tb, Hp), lambda i: (i, 0)),
        ),
        compiler_params=pltpu.CompilerParams(
            dimension_semantics=("parallel",),
        ),
        cost_estimate=cost,
    )(x2d, w2d, b2d)

    if not trim:
        return out
    if Bp == B and Hp == embed_dim:
        return out                              # no padding -> no slice copy
    # NOTE: this slice costs an extra HBM read+write of the output; prefer
    # trim=False (or in-consumer fusion) when the padded layout is acceptable.
    return out[:B, :embed_dim]


if __name__ == "__main__":
    embed_dim = 64          # -> H = 32
    scale = 30.0
    B = 8

    key = jax.random.PRNGKey(0)
    k_w, k_x = jax.random.split(key)

    # Frozen "random" parameter, like torch.randn(embed_dim//2) * scale.
    W = jax.random.normal(k_w, (embed_dim // 2,), dtype=jnp.float32) * scale
    # Example timesteps.
    x = jax.random.uniform(k_x, (B,), dtype=jnp.float32)

    w_full, bias = make_gfp_tables(W)           # one-time parameter fold

    # f32 path (matches PyTorch semantics).
    out = gaussian_fourier_projection(x, w_full, bias, embed_dim)
    out = jax.block_until_ready(out)

    # Reference in plain JAX (PyTorch semantics: [sin(x*W*2pi), cos(...)]).
    proj_ref = x[:, None] * W[None, :] * 2.0 * np.pi
    ref = jnp.concatenate([jnp.sin(proj_ref), jnp.cos(proj_ref)], axis=-1)
    assert out.shape == (B, embed_dim), out.shape
    # Tolerance note: pre-folding 2*pi into W and using sin(theta + pi/2) for
    # the cos half differ from the reference by ~1 ulp of the large-magnitude
    # (~1e2) f32 angle, so absolute error can reach ~1e-4 after range reduction.
    np.testing.assert_allclose(np.asarray(out), np.asarray(ref),
                               rtol=1e-5, atol=5e-4)

    # bf16 output path (cast-at-store; preferred when the consumer tolerates
    # it — halves HBM writeback on the memory-bound regime).
    out_bf16 = gaussian_fourier_projection(x, w_full, bias, embed_dim,
                                           out_dtype=jnp.bfloat16)
    out_bf16 = jax.block_until_ready(out_bf16)
    assert out_bf16.shape == (B, embed_dim), out_bf16.shape
    np.testing.assert_allclose(np.asarray(out_bf16, dtype=np.float32),
                               np.asarray(ref), rtol=1e-2, atol=2e-2)

    print("KERNEL_OK")
</pallas_src>

<mosaic_0001>
module attributes {stable_mosaic.version = 11 : i64} {
  func.func @_gfp_kernel(%arg0: i32, %arg1: memref<8x1xf32, #tpu.memory_space<vmem>>, %arg2: memref<1x128xf32, #tpu.memory_space<vmem>>, %arg3: memref<1x128xf32, #tpu.memory_space<vmem>>, %arg4: memref<8x128xf32, #tpu.memory_space<vmem>>) attributes {dimension_semantics = [#tpu.dimension_semantics<parallel>], iteration_bounds = array<i64: 1>, scalar_prefetch = 0 : i64, scratch_operands = 0 : i64, tpu.core_type = #tpu.core_type<tc>, window_params = [{transform_indices = @transform_0, window_bounds = array<i64: 8, 1>}, {pipeline_mode = #tpu.pipeline_mode<synchronous>, transform_indices = @transform_1, window_bounds = array<i64: 1, 128>}, {pipeline_mode = #tpu.pipeline_mode<synchronous>, transform_indices = @transform_2, window_bounds = array<i64: 1, 128>}, {transform_indices = @transform_3, window_bounds = array<i64: 8, 128>}]} {
    %c0 = arith.constant 0 : index
    %c0_0 = arith.constant 0 : index
    %0 = vector.load %arg1[%c0, %c0_0] : memref<8x1xf32, #tpu.memory_space<vmem>>, vector<8x1xf32>
    %c0_1 = arith.constant 0 : index
    %c0_2 = arith.constant 0 : index
    %1 = vector.load %arg2[%c0_1, %c0_2] : memref<1x128xf32, #tpu.memory_space<vmem>>, vector<1x128xf32>
    %2 = vector.broadcast %0 : vector<8x1xf32> to vector<8x128xf32>
    %3 = vector.broadcast %1 : vector<1x128xf32> to vector<8x128xf32>
    %4 = arith.mulf %2, %3 : vector<8x128xf32>
    %c0_3 = arith.constant 0 : index
    %c0_4 = arith.constant 0 : index
    %5 = vector.load %arg3[%c0_3, %c0_4] : memref<1x128xf32, #tpu.memory_space<vmem>>, vector<1x128xf32>
    %6 = vector.broadcast %5 : vector<1x128xf32> to vector<8x128xf32>
    %7 = arith.addf %4, %6 : vector<8x128xf32>
    %8 = math.sin %7 : vector<8x128xf32>
    %c0_5 = arith.constant 0 : index
    %c0_6 = arith.constant 0 : index
    %9 = vector.load %arg4[%c0_5, %c0_6] : memref<8x128xf32, #tpu.memory_space<vmem>>, vector<8x128xf32>
    tpu.vector_store %arg4[%c0_5, %c0_6], %8 {strides = array<i32>} : memref<8x128xf32, #tpu.memory_space<vmem>>, vector<8x128xf32>,
    return
  }
  func.func @transform_0(%arg0: i32) -> (i32, i32) {
    %c0_i32 = arith.constant 0 : i32
    %c0_i32_0 = arith.constant 0 : i32
    return %arg0, %c0_i32 : i32, i32
  }
  func.func @transform_1(%arg0: i32) -> (i32, i32) {
    %c0_i32 = arith.constant 0 : i32
    %c0_i32_0 = arith.constant 0 : i32
    %c0_i32_1 = arith.constant 0 : i32
    return %c0_i32, %c0_i32_0 : i32, i32
  }
  func.func @transform_2(%arg0: i32) -> (i32, i32) {
    %c0_i32 = arith.constant 0 : i32
    %c0_i32_0 = arith.constant 0 : i32
    %c0_i32_1 = arith.constant 0 : i32
    return %c0_i32, %c0_i32_0 : i32, i32
  }
  func.func @transform_3(%arg0: i32) -> (i32, i32) {
    %c0_i32 = arith.constant 0 : i32
    %c0_i32_0 = arith.constant 0 : i32
    return %arg0, %c0_i32 : i32, i32
  }
}

</mosaic_0001>

<bundles_post_ra>
// kernel: tpu_custom_call.1
= control target key start
LH: loop header
LB: loop body
LE: loop exit
PB: predicated region body
PF: predicated region fallthrough
CT: control target
= control target key end

     0   :  { %v243_v1 = vmov 0   ;;  %s334_s0 = inlined_call_operand.vmem [shape: f32[8,1], index: 0, kind: input, shape index: {}]   ;;  %s335_s1 = inlined_call_operand.vmem [shape: f32[1,128], index: 1, kind: input, shape index: {}]   ;;  %s336_s2 = inlined_call_operand.vmem [shape: f32[1,128], index: 2, kind: input, shape index: {}]   ;;  %s337_s3 = inlined_call_operand.hbm [shape: f32[8,128], index: 3, kind: output, shape index: {}]  }
   0x1   :  { %v15_v0 = vld [vmem:[%s334_s0] sm:$0xff]  ;;  %214 = vset.pattern.permute.xlu0 %v243_v1 }
   0x2   :  { %19 = vperm.xlu0 %214, %v15_v0  }
   0x3   :  { %8 = vsyncpa [#allocation3], 0  ;;  %v215_v2 = vld [vmem:[%s335_s1] ss:$0 sm:$0xff]  ;;  %v244_v18 = vmov 683565275  }
   0x4   :  { %v216_v3 = vld [vmem:[%s336_s2] ss:$0 sm:$0xff]  ;;  %v245_v20 = vmov 2475754826   ;;  %v246_v22 = vmov 2131351028  }
   0x5   :  { %v247_v24 = vmov 2102212464   ;;  %v248_v29 = vmov 920167782   ;;  %v249_v32 = vmov 1326507024  }
   0x6   :  { %s250_s0 = smov [#allocation2]   ;;  %s194_s19 = sshll.u32 %s337_s3, 4  ;;  %s195_s19 = int_to_ptr.hbm [resolvable:$true] %s194_s19 }
   0x7   :  { %s192_s1 = sshll.u32 %s250_s0, 4  ;;  %s193_s1 = int_to_ptr.vmem [resolvable:$true] %s192_s1 }
  0x74   :  { %v20_v4 = vpop.permute.xlu0 %19 }
  0x75   :  { %v25_v5 = vmul.f32 %v215_v2, %v20_v4 }
  0x77   :  { %v281_v6 = vadd.f32 %v216_v3, %v25_v5 }
  0x79   :  { %v34_v7 = vand.u32 2139095040, %v281_v6  ;;  %v31_v9 = vand.u32 2147483647, %v281_v6  ;;  %vm33_vm12 = vcmp.lt.s32.totalorder %v281_v6, 0 }
  0x7b   :  { %v35_v8 = vshrl.u32 %v34_v7, 23  ;;  %v38_v12 = vand.u32 8388607, %v31_v9  ;;  %vm32_vm13 = vcmp.le.f32.partialorder %v31_v9, 0.7853982 }
  0x7d   :  { %v203_v10 = vadd.s32 4294967169, %v35_v8  ;;  %v39_v15 = vor.u32 8388608, %v38_v12 }
  0x7f   :  { %v41_v11 = vadd.s32 1, %v203_v10  ;;  %v289_v34 = vshll.u32 %v39_v15, 8 }
  0x81   :  { %vm42_vm0 = vcmp.gt.s32.totalorder %v41_v11, 0  ;;  %v80_v46 = vand.u32 65535, %v289_v34  ;;  %v81_v48 = vshrl.u32 %v289_v34, 16 }
  0x82   :  { %v43_v13 = vsel %vm42_vm0, %v41_v11, 0 }
  0x83   :  { %v45_v14 = vand.u32 31, %v43_v13  ;;  %v287_v16 = vshrl.u32 %v43_v13, 5 }
  0x85   :  { %v46_v17 = vsub.s32 32, %v45_v14  ;;  %v48_v19 = vshll.u32 %v244_v18, %v45_v14  ;;  %v51_v21 = vshll.u32 %v245_v20, %v45_v14  ;;  %v54_v23 = vshll.u32 %v246_v22, %v45_v14 }
  0x86   :  { %v57_v25 = vshll.u32 %v247_v24, %v45_v14  ;;  %v60_v31 = vshll.u32 %v248_v29, %v45_v14  ;;  %vm63_vm1 = vcmp.lt.s32.totalorder %v287_v16, 1  ;;  %vm66_vm2 = vcmp.lt.s32.totalorder %v287_v16, 4 }
  0x87   :  { %v49_v26 = vshrl.u32 %v245_v20, %v46_v17  ;;  %v52_v27 = vshrl.u32 %v246_v22, %v46_v17  ;;  %v55_v28 = vshrl.u32 %v247_v24, %v46_v17  ;;  %v58_v30 = vshrl.u32 %v248_v29, %v46_v17 }
  0x88   :  { %v61_v33 = vshrl.u32 %v249_v32, %v46_v17  ;;  %vm65_vm3 = vcmp.lt.s32.totalorder %v287_v16, 3  ;;  %vm64_vm4 = vcmp.lt.s32.totalorder %v287_v16, 2  ;;  %v47_v11 = vshrl.u32 %v244_v18, %v46_v17 }
  0x89   :  { %v50_v35 = vor.u32 %v49_v26, %v48_v19  ;;  %v53_v36 = vor.u32 %v52_v27, %v51_v21  ;;  %v56_v37 = vor.u32 %v55_v28, %v54_v23  ;;  %v59_v38 = vor.u32 %v58_v30, %v57_v25 }
  0x8a   :  { %v62_v39 = vor.u32 %v61_v33, %v60_v31 }
  0x8b   :  { %v71_v40 = vsel %vm63_vm1, %v50_v35, %v53_v36  ;;  %v72_v41 = vsel %vm66_vm2, %v59_v38, 920167782  ;;  %v75_v42 = vsel %vm63_vm1, %v53_v36, %v56_v37  ;;  %v68_v7 = vsel %vm66_vm2, %v56_v37, 2102212464 }
  0x8c   :  { %v73_v43 = vsel %vm65_vm3, %v56_v37, %v72_v41  ;;  %v76_v44 = vsel %vm66_vm2, %v62_v39, 1326507024  ;;  %v67_v20 = vsel %vm63_vm1, %v47_v11, %v50_v35  ;;  %v69_v21 = vsel %vm65_vm3, %v53_v36, %v68_v7 }
  0x8d   :  { %v77_v45 = vsel %vm65_vm3, %v59_v38, %v76_v44  ;;  %v74_v47 = vsel %vm64_vm4, %v71_v40, %v73_v43  ;;  %v70_v18 = vsel %vm64_vm4, %v67_v20, %v69_v21  ;;  %vm174_vm1 = vweird.f32 %v281_v6 }
  0x8e   :  { %v78_v49 = vsel %vm64_vm4, %v75_v42, %v77_v45  ;;  %v104_v50 = vand.u32 65535, %v74_v47  ;;  %v105_v51 = vshrl.u32 %v74_v47, 16  ;;  %v124_v30 = vmul.u32 %v289_v34, %v70_v18 }
  0x8f   :  { %v82_v52 = vand.u32 65535, %v78_v49  ;;  %v83_v53 = vshrl.u32 %v78_v49, 16 }
  0x90   :  { %v107_v54 = vmul.u32 %v105_v51, %v80_v46  ;;  %v108_v55 = vmul.u32 %v104_v50, %v81_v48  ;;  %v106_v58 = vmul.u32 %v104_v50, %v80_v46  ;;  %v109_v62 = vmul.u32 %v105_v51, %v81_v48 }
  0x91   :  { %v85_v56 = vmul.u32 %v83_v53, %v80_v46  ;;  %v86_v57 = vmul.u32 %v82_v52, %v81_v48  ;;  %v84_v60 = vmul.u32 %v82_v52, %v80_v46  ;;  %v87_v63 = vmul.u32 %v83_v53, %v81_v48 }
  0x92   :  { %v110_v59 = vshll.u32 %v107_v54, 16  ;;  %v112_v0 = vshll.u32 %v108_v55, 16  ;;  %v111_v15 = vshrl.u32 %v107_v54, 16  ;;  %v113_v24 = vshrl.u32 %v108_v55, 16 }
  0x93   :  { %v88_v61 = vshll.u32 %v85_v56, 16  ;;  %v90_v3 = vshll.u32 %v86_v57, 16  ;;  %v89_v22 = vshrl.u32 %v85_v56, 16  ;;  %v91_v26 = vshrl.u32 %v86_v57, 16 }
  0x94   :  { %vm114_vm5 = vc.u32 %v106_v58, %v110_v59  ;;  %v116_v2 = vadd.s32 %v110_v59, %v106_v58 }
  0x95   :  { %vm92_vm6 = vc.u32 %v84_v60, %v88_v61  ;;  %v94_v4 = vadd.s32 %v88_v61, %v84_v60  ;;  %v115_v5 = vsel %vm114_vm5, 1, %v243_v1 }
  0x96   :  { %v93_v8 = vsel %vm92_vm6, 1, %v243_v1  ;;  %v117_v10 = vadd.s32 %v115_v5, %v109_v62  ;;  %vm118_vm7 = vc.u32 %v116_v2, %v112_v0 }
  0x97   :  { %v95_v12 = vadd.s32 %v93_v8, %v87_v63  ;;  %vm96_vm8 = vc.u32 %v94_v4, %v90_v3  ;;  %v119_v13 = vsel %vm118_vm7, 1, %v243_v1 }
  0x98   :  { %v97_v14 = vsel %vm96_vm8, 1, %v243_v1  ;;  %v121_v19 = vadd.s32 %v119_v13, %v117_v10  ;;  %v120_v1 = vadd.s32 %v116_v2, %v112_v0 }
  0x99   :  { %v99_v23 = vadd.s32 %v97_v14, %v95_v12 }
  0x9a   :  { %v122_v25 = vadd.s32 %v121_v19, %v111_v15 }
  0x9b   :  { %v100_v17 = vadd.s32 %v99_v23, %v89_v22 }
  0x9c   :  { %v123_v27 = vadd.s32 %v122_v25, %v113_v24 }
  0x9d   :  { %v101_v28 = vadd.s32 %v100_v17, %v91_v26 }
  0x9e   :  { %v127_v29 = vadd.s32 1, %v123_v27 }
  0x9f   :  { %vm126_vm9 = vc.u32 %v101_v28, %v120_v1  ;;  %v125_v42 = vadd.s32 %v120_v1, %v101_v28 }
  0xa0   :  { %v128_v31 = vsel %vm126_vm9, %v127_v29, %v123_v27 }
  0xa1   :  { %v129_v32 = vadd.s32 %v128_v31, %v124_v30 }
  0xa3   :  { %v130_v33 = vadd.s32 536870912, %v129_v32 }
  0xa5   :  { %v131_v35 = vshrl.u32 %v130_v33, 30 }
  0xa7   :  { %v132_v36 = vshll.u32 %v131_v35, 30  ;;  %v155_v55 = vsub.s32 4, %v131_v35 }
  0xa9   :  { %v133_v37 = vsub.s32 %v129_v32, %v132_v36  ;;  %v156_v60 = vsel %vm33_vm12, %v155_v55, %v131_v35 }
  0xaa   :  { %v158_v63 = vsel %vm32_vm13, 0, %v156_v60 }
  0xab   :  { %vm134_vm10 = vcmp.lt.s32.totalorder %v133_v37, 0  ;;  %v135_v38 = vsub.s32 0, %v133_v37  ;;  %v175_v5 = vadd.s32 3, %v158_v63 }
  0xad   :  { %v136_v39 = vsel %vm134_vm10, %v135_v38, %v133_v37  ;;  %v176_v11 = vand.u32 3, %v175_v5 }
  0xae   :  { %v137_v40 = vclz %v136_v39 }
  0xaf   :  { %vm178_vm14 = vcmp.eq.s32.totalorder %v176_v11, 0  ;;  %vm181_vm15 = vcmp.eq.s32.totalorder %v176_v11, 2  ;;  %vm177_vm0 = vcmp.lt.s32.totalorder %v176_v11, 2 }
  0xb0   :  { %v204_v41 = vadd.s32 4294967294, %v137_v40 }
  0xb2   :  { %vm205_vm11 = vcmp.lt.s32.totalorder %v204_v41, 0 }
  0xb3   :  { %v140_v16 = vsel %vm205_vm11, 0, %v204_v41 }
  0xb4   :  { %v141_v43 = vsub.s32 32, %v140_v16  ;;  %v145_v44 = vsub.s32 4294967266, %v140_v16  ;;  %v142_v45 = vshll.u32 %v133_v37, %v140_v16 }
  0xb6   :  { %v143_v46 = vshrl.u32 %v125_v42, %v141_v43  ;;  %v146_v34 = vadd.s32 127, %v145_v44 }
  0xb8   :  { %v144_v47 = vor.u32 %v143_v46, %v142_v45  ;;  %v147_v48 = vshll.u32 %v146_v34, 23 }
  0xba   :  { %v148_v49 = vor.u32 4788187, %v147_v48  ;;  %v151_v51 = vcvt.s32.f32 %v144_v47 }
  0xbc   :  { %v149_v50 = vand.u32 2147483647, %v148_v49 }
  0xbe   :  { %v152_v52 = vmul.f32 %v151_v51, %v149_v50 }
  0xc0   :  { %v153_v53 = vxor.u32 2147483648, %v152_v52 }
  0xc2   :  { %v154_v54 = vsel %vm33_vm12, %v153_v53, %v152_v52 }
  0xc3   :  { %v157_v56 = vsel %vm32_vm13, %v281_v6, %v154_v54 }
  0xc4   :  { %v159_v57 = vmul.f32 %v157_v56, %v157_v56 }
  0xc6   :  { %v160_v58 = vmul.f32 -0.001358992, %v159_v57  ;;  %v167_v59 = vmul.f32 -0.00019511016, %v159_v57 }
  0xc8   :  { %v161_v61 = vadd.f32 0.041655596, %v160_v58  ;;  %v168_v62 = vadd.f32 0.008332121, %v167_v59 }
  0xca   :  { %v162_v0 = vmul.f32 %v161_v61, %v159_v57  ;;  %v169_v2 = vmul.f32 %v168_v62, %v159_v57 }
  0xcc   :  { %v163_v3 = vadd.f32 -0.4999988, %v162_v0  ;;  %v170_v4 = vadd.f32 -0.16666654, %v169_v2 }
  0xce   :  { %v164_v7 = vmul.f32 %v163_v3, %v159_v57  ;;  %v171_v8 = vmul.f32 %v170_v4, %v159_v57 }
  0xd0   :  { %v165_v10 = vadd.f32 1.0, %v164_v7  ;;  %v172_v9 = vadd.f32 1.0, %v171_v8 }
  0xd2   :  { %v173_v12 = vmul.f32 %v172_v9, %v157_v56  ;;  %v182_v13 = vxor.u32 2147483648, %v165_v10 }
  0xd4   :  { %v179_v14 = vxor.u32 2147483648, %v173_v12  ;;  %v183_v19 = vsel %vm181_vm15, %v182_v13, %v173_v12 }
  0xd6   :  { %v180_v15 = vsel %vm178_vm14, %v165_v10, %v179_v14 }
  0xd7   :  { %v184_v20 = vsel %vm177_vm0, %v180_v15, %v183_v19 }
  0xd8   :  { %v185_v21 = vsel %vm174_vm1, nan, %v184_v20 }
  0xd9   :  { %186 = vst [vmem:[#allocation2] sm:$0xff] %v185_v21 }
  0xda   :  { %197 = dma.vmem_to_hbm [thread:$0]  %s193_s1, 128, %s195_s19, [#allocation3]  }
  0xdb   :  { %241 = dma.done.wait [#allocation3], 128  }
  0xdc   :  { %242 = vsyncadd [#allocation3], 4294967168 }
  0xdd   :  { %202 = vsyncpa [#allocation3], 1 }

</bundles_post_ra>
